<compile_context>
chip_gen: v7x
topology: tpu7x:2x2x1
jax: 0.10.0
libtpu: 0.0.40
codegen_flags: <defaults>
</compile_context>

<pallas_src>
import jax
import jax.numpy as jnp
from jax.experimental import pallas as pl
from jax.experimental.pallas import tpu as pltpu


LANES = 128


def ae3_kernel(x_ref,
               w1, b1, w2, b2, w3, b3,      # encoder3 (lane-packed block-diag weights)
               w4, b4, w5, b5, w6, b6,      # decoder3
               o_ref):
    """Fused forward for one batch tile: decoder3(encoder3(x))."""
    h = x_ref[...]                           # already f32

    def linear(h, w_ref, b_ref):
        return jnp.dot(h, w_ref[...], preferred_element_type=jnp.float32) + b_ref[...]

    # encoder3: Linear -> ReLU -> Linear -> ReLU -> Linear (no act on the code)
    h = jnp.maximum(linear(h, w1, b1), 0.0)
    h = jnp.maximum(linear(h, w2, b2), 0.0)
    h = linear(h, w3, b3)
    # decoder3: Linear -> ReLU -> Linear -> ReLU -> Linear (no act on the output)
    h = jnp.maximum(linear(h, w4, b4), 0.0)
    h = jnp.maximum(linear(h, w5, b5), 0.0)
    o_ref[...] = linear(h, w6, b6).astype(o_ref.dtype)


def _pack_params(params, pack):
    """Expand each (in, out) weight to block-diag kron(I_pack, W) -> (in*pack, out*pack);
    tile each (1, out) bias to (1, out*pack)."""
    packed = []
    for w, b in params:
        fi, fo = w.shape
        if pack == 1:
            packed.append((w, b.reshape(1, fo)))
        else:
            wp = jnp.kron(jnp.eye(pack, dtype=w.dtype), w)     # (fi*pack, fo*pack)
            bp = jnp.tile(b.reshape(1, fo), (1, pack))          # (1, fo*pack)
            packed.append((wp, bp))
    return packed


def _round_up(x, m):
    return ((x + m - 1) // m) * m


def ae3_forward(x, params, *, tile_rows=512):
    """params: list of (W, b) with W shaped (in, out), b shaped (1, out)."""
    B, d_in = x.shape

    # How many batch rows fit in one 128-lane row.
    pack = LANES // d_in if (d_in < LANES and LANES % d_in == 0) else 1
    lane_w = d_in * pack

    # Packed-row count, tile size (multiple of 8 sublanes), and padding.
    rows = pl.cdiv(B, pack)
    tile_r = _round_up(min(tile_rows, _round_up(rows, 8)), 8)
    rows_p = _round_up(rows, tile_r)
    b_pad = rows_p * pack
    if b_pad != B:
        x = jnp.pad(x, ((0, b_pad - B), (0, 0)))
    x_view = x.reshape(rows_p, lane_w)        # free reshape (row-major)

    flat = []
    for w, b in _pack_params(params, pack):
        flat.extend([w, b])

    grid = (rows_p // tile_r,)
    x_spec = pl.BlockSpec((tile_r, lane_w), lambda i: (i, 0))
    param_specs = [pl.BlockSpec(a.shape, lambda i: (0, 0)) for a in flat]
    out_spec = pl.BlockSpec((tile_r, lane_w), lambda i: (i, 0))

    out_view = pl.pallas_call(
        ae3_kernel,
        out_shape=jax.ShapeDtypeStruct((rows_p, lane_w), jnp.float32),
        grid=grid,
        in_specs=[x_spec] + param_specs,
        out_specs=out_spec,
        compiler_params=pltpu.CompilerParams(
            dimension_semantics=("parallel",),   # split batch tiles across v7x's 2 TCs
            vmem_limit_bytes=8 << 20,            # actual footprint ~1 MiB; leave headroom
        ),
    )(x_view, *flat)

    out = out_view.reshape(b_pad, d_in)
    return out[:B] if b_pad != B else out


def init_linear(key, fan_in, fan_out):
    """Deterministic init mimicking nn.Linear's uniform(-1/sqrt(fan_in), 1/sqrt(fan_in))."""
    kw, kb = jax.random.split(key)
    bound = 1.0 / jnp.sqrt(jnp.float32(fan_in))
    w = jax.random.uniform(kw, (fan_in, fan_out), jnp.float32, -bound, bound)   # (in, out)
    b = jax.random.uniform(kb, (1, fan_out), jnp.float32, -bound, bound)
    return w, b


def reference_forward(x, params):
    h = x
    for i, (w, b) in enumerate(params):
        h = h @ w + b
        if i not in (2, 5):       # ReLU everywhere except code and final output
            h = jnp.maximum(h, 0.0)
    return h


if __name__ == "__main__":
    # cfg: ae3_input=64, ae3_hidden1=32, ae3_hidden2=16, ae3_output=8
    B, D_IN, H1, H2, D_OUT = 1000, 64, 32, 16, 8   # B not a multiple of tile -> exercises padding

    key = jax.random.PRNGKey(0)
    kx, *layer_keys = jax.random.split(key, 7)

    x = jax.random.normal(kx, (B, D_IN), jnp.float32)

    dims = [(D_IN, H1), (H1, H2), (H2, D_OUT),      # encoder3
            (D_OUT, H2), (H2, H1), (H1, D_IN)]      # decoder3
    params = [init_linear(k, fi, fo) for k, (fi, fo) in zip(layer_keys, dims)]

    out = ae3_forward(x, params, tile_rows=128)     # grid of 4 batch tiles
    out = jax.block_until_ready(out)

    ref = reference_forward(x, params)
    assert out.shape == (B, D_IN)
    assert jnp.allclose(out, ref, atol=1e-4, rtol=1e-4), "mismatch vs JAX reference"

    print("KERNEL_OK")
</pallas_src>

<mosaic_0001>
module attributes {stable_mosaic.version = 11 : i64} {
  func.func @ae3_kernel(%arg0: i32, %arg1: memref<128x128xf32, #tpu.memory_space<vmem>>, %arg2: memref<128x64xf32, #tpu.memory_space<vmem>>, %arg3: memref<1x64xf32, #tpu.memory_space<vmem>>, %arg4: memref<64x32xf32, #tpu.memory_space<vmem>>, %arg5: memref<1x32xf32, #tpu.memory_space<vmem>>, %arg6: memref<32x16xf32, #tpu.memory_space<vmem>>, %arg7: memref<1x16xf32, #tpu.memory_space<vmem>>, %arg8: memref<16x32xf32, #tpu.memory_space<vmem>>, %arg9: memref<1x32xf32, #tpu.memory_space<vmem>>, %arg10: memref<32x64xf32, #tpu.memory_space<vmem>>, %arg11: memref<1x64xf32, #tpu.memory_space<vmem>>, %arg12: memref<64x128xf32, #tpu.memory_space<vmem>>, %arg13: memref<1x128xf32, #tpu.memory_space<vmem>>, %arg14: memref<128x128xf32, #tpu.memory_space<vmem>>) attributes {dimension_semantics = [#tpu.dimension_semantics<parallel>], iteration_bounds = array<i64: 4>, scalar_prefetch = 0 : i64, scratch_operands = 0 : i64, tpu.core_type = #tpu.core_type<tc>, window_params = [{transform_indices = @transform_0, window_bounds = array<i64: 128, 128>}, {pipeline_mode = #tpu.pipeline_mode<synchronous>, transform_indices = @transform_1, window_bounds = array<i64: 128, 64>}, {pipeline_mode = #tpu.pipeline_mode<synchronous>, transform_indices = @transform_2, window_bounds = array<i64: 1, 64>}, {pipeline_mode = #tpu.pipeline_mode<synchronous>, transform_indices = @transform_3, window_bounds = array<i64: 64, 32>}, {pipeline_mode = #tpu.pipeline_mode<synchronous>, transform_indices = @transform_4, window_bounds = array<i64: 1, 32>}, {pipeline_mode = #tpu.pipeline_mode<synchronous>, transform_indices = @transform_5, window_bounds = array<i64: 32, 16>}, {pipeline_mode = #tpu.pipeline_mode<synchronous>, transform_indices = @transform_6, window_bounds = array<i64: 1, 16>}, {pipeline_mode = #tpu.pipeline_mode<synchronous>, transform_indices = @transform_7, window_bounds = array<i64: 16, 32>}, {pipeline_mode = #tpu.pipeline_mode<synchronous>, transform_indices = @transform_8, window_bounds = array<i64: 1, 32>}, {pipeline_mode = #tpu.pipeline_mode<synchronous>, transform_indices = @transform_9, window_bounds = array<i64: 32, 64>}, {pipeline_mode = #tpu.pipeline_mode<synchronous>, transform_indices = @transform_10, window_bounds = array<i64: 1, 64>}, {pipeline_mode = #tpu.pipeline_mode<synchronous>, transform_indices = @transform_11, window_bounds = array<i64: 64, 128>}, {pipeline_mode = #tpu.pipeline_mode<synchronous>, transform_indices = @transform_12, window_bounds = array<i64: 1, 128>}, {transform_indices = @transform_13, window_bounds = array<i64: 128, 128>}]} {
    %c0 = arith.constant 0 : index
    %c0_0 = arith.constant 0 : index
    %0 = vector.load %arg1[%c0, %c0_0] : memref<128x128xf32, #tpu.memory_space<vmem>>, vector<128x128xf32>
    %c0_1 = arith.constant 0 : index
    %c0_2 = arith.constant 0 : index
    %1 = vector.load %arg2[%c0_1, %c0_2] : memref<128x64xf32, #tpu.memory_space<vmem>>, vector<128x64xf32>
    %cst = arith.constant dense<0.000000e+00> : vector<128x64xf32>
    %2 = tpu.matmul %0, %1, %cst {dimension_numbers = #tpu.dot_dimension_numbers<[1], [0], [0], [1], [0, 0, 1, 1], [], []>} : vector<128x128xf32>, vector<128x64xf32>, vector<128x64xf32> -> vector<128x64xf32>
    %c0_3 = arith.constant 0 : index
    %c0_4 = arith.constant 0 : index
    %3 = vector.load %arg3[%c0_3, %c0_4] : memref<1x64xf32, #tpu.memory_space<vmem>>, vector<1x64xf32>
    %4 = vector.broadcast %3 : vector<1x64xf32> to vector<128x64xf32>
    %5 = arith.addf %2, %4 : vector<128x64xf32>
    %cst_5 = arith.constant 0.000000e+00 : f32
    %6 = vector.broadcast %cst_5 : f32 to vector<128x64xf32>
    %7 = arith.maximumf %5, %6 : vector<128x64xf32>
    %c0_6 = arith.constant 0 : index
    %c0_7 = arith.constant 0 : index
    %8 = vector.load %arg4[%c0_6, %c0_7] : memref<64x32xf32, #tpu.memory_space<vmem>>, vector<64x32xf32>
    %cst_8 = arith.constant dense<0.000000e+00> : vector<128x32xf32>
    %9 = tpu.matmul %7, %8, %cst_8 {dimension_numbers = #tpu.dot_dimension_numbers<[1], [0], [0], [1], [0, 0, 1, 1], [], []>} : vector<128x64xf32>, vector<64x32xf32>, vector<128x32xf32> -> vector<128x32xf32>
    %c0_9 = arith.constant 0 : index
    %c0_10 = arith.constant 0 : index
    %10 = vector.load %arg5[%c0_9, %c0_10] : memref<1x32xf32, #tpu.memory_space<vmem>>, vector<1x32xf32>
    %11 = vector.broadcast %10 : vector<1x32xf32> to vector<128x32xf32>
    %12 = arith.addf %9, %11 : vector<128x32xf32>
    %cst_11 = arith.constant 0.000000e+00 : f32
    %13 = vector.broadcast %cst_11 : f32 to vector<128x32xf32>
    %14 = arith.maximumf %12, %13 : vector<128x32xf32>
    %c0_12 = arith.constant 0 : index
    %c0_13 = arith.constant 0 : index
    %15 = vector.load %arg6[%c0_12, %c0_13] : memref<32x16xf32, #tpu.memory_space<vmem>>, vector<32x16xf32>
    %cst_14 = arith.constant dense<0.000000e+00> : vector<128x16xf32>
    %16 = tpu.matmul %14, %15, %cst_14 {dimension_numbers = #tpu.dot_dimension_numbers<[1], [0], [0], [1], [0, 0, 1, 1], [], []>} : vector<128x32xf32>, vector<32x16xf32>, vector<128x16xf32> -> vector<128x16xf32>
    %c0_15 = arith.constant 0 : index
    %c0_16 = arith.constant 0 : index
    %17 = vector.load %arg7[%c0_15, %c0_16] : memref<1x16xf32, #tpu.memory_space<vmem>>, vector<1x16xf32>
    %18 = vector.broadcast %17 : vector<1x16xf32> to vector<128x16xf32>
    %19 = arith.addf %16, %18 : vector<128x16xf32>
    %c0_17 = arith.constant 0 : index
    %c0_18 = arith.constant 0 : index
    %20 = vector.load %arg8[%c0_17, %c0_18] : memref<16x32xf32, #tpu.memory_space<vmem>>, vector<16x32xf32>
    %cst_19 = arith.constant dense<0.000000e+00> : vector<128x32xf32>
    %21 = tpu.matmul %19, %20, %cst_19 {dimension_numbers = #tpu.dot_dimension_numbers<[1], [0], [0], [1], [0, 0, 1, 1], [], []>} : vector<128x16xf32>, vector<16x32xf32>, vector<128x32xf32> -> vector<128x32xf32>
    %c0_20 = arith.constant 0 : index
    %c0_21 = arith.constant 0 : index
    %22 = vector.load %arg9[%c0_20, %c0_21] : memref<1x32xf32, #tpu.memory_space<vmem>>, vector<1x32xf32>
    %23 = vector.broadcast %22 : vector<1x32xf32> to vector<128x32xf32>
    %24 = arith.addf %21, %23 : vector<128x32xf32>
    %cst_22 = arith.constant 0.000000e+00 : f32
    %25 = vector.broadcast %cst_22 : f32 to vector<128x32xf32>
    %26 = arith.maximumf %24, %25 : vector<128x32xf32>
    %c0_23 = arith.constant 0 : index
    %c0_24 = arith.constant 0 : index
    %27 = vector.load %arg10[%c0_23, %c0_24] : memref<32x64xf32, #tpu.memory_space<vmem>>, vector<32x64xf32>
    %cst_25 = arith.constant dense<0.000000e+00> : vector<128x64xf32>
    %28 = tpu.matmul %26, %27, %cst_25 {dimension_numbers = #tpu.dot_dimension_numbers<[1], [0], [0], [1], [0, 0, 1, 1], [], []>} : vector<128x32xf32>, vector<32x64xf32>, vector<128x64xf32> -> vector<128x64xf32>
    %c0_26 = arith.constant 0 : index
    %c0_27 = arith.constant 0 : index
    %29 = vector.load %arg11[%c0_26, %c0_27] : memref<1x64xf32, #tpu.memory_space<vmem>>, vector<1x64xf32>
    %30 = vector.broadcast %29 : vector<1x64xf32> to vector<128x64xf32>
    %31 = arith.addf %28, %30 : vector<128x64xf32>
    %cst_28 = arith.constant 0.000000e+00 : f32
    %32 = vector.broadcast %cst_28 : f32 to vector<128x64xf32>
    %33 = arith.maximumf %31, %32 : vector<128x64xf32>
    %c0_29 = arith.constant 0 : index
    %c0_30 = arith.constant 0 : index
    %34 = vector.load %arg12[%c0_29, %c0_30] : memref<64x128xf32, #tpu.memory_space<vmem>>, vector<64x128xf32>
    %cst_31 = arith.constant dense<0.000000e+00> : vector<128x128xf32>
    %35 = tpu.matmul %33, %34, %cst_31 {dimension_numbers = #tpu.dot_dimension_numbers<[1], [0], [0], [1], [0, 0, 1, 1], [], []>} : vector<128x64xf32>, vector<64x128xf32>, vector<128x128xf32> -> vector<128x128xf32>
    %c0_32 = arith.constant 0 : index
    %c0_33 = arith.constant 0 : index
    %36 = vector.load %arg13[%c0_32, %c0_33] : memref<1x128xf32, #tpu.memory_space<vmem>>, vector<1x128xf32>
    %37 = vector.broadcast %36 : vector<1x128xf32> to vector<128x128xf32>
    %38 = arith.addf %35, %37 : vector<128x128xf32>
    %c0_34 = arith.constant 0 : index
    %c0_35 = arith.constant 0 : index
    %39 = vector.load %arg14[%c0_34, %c0_35] : memref<128x128xf32, #tpu.memory_space<vmem>>, vector<128x128xf32>
    tpu.vector_store %arg14[%c0_34, %c0_35], %38 {strides = array<i32>} : memref<128x128xf32, #tpu.memory_space<vmem>>, vector<128x128xf32>,
    return
  }
  func.func @transform_0(%arg0: i32) -> (i32, i32) {
    %c0_i32 = arith.constant 0 : i32
    %c0_i32_0 = arith.constant 0 : i32
    return %arg0, %c0_i32 : i32, i32
  }
  func.func @transform_1(%arg0: i32) -> (i32, i32) {
    %c0_i32 = arith.constant 0 : i32
    %c0_i32_0 = arith.constant 0 : i32
    %c0_i32_1 = arith.constant 0 : i32
    return %c0_i32, %c0_i32_0 : i32, i32
  }
  func.func @transform_2(%arg0: i32) -> (i32, i32) {
    %c0_i32 = arith.constant 0 : i32
    %c0_i32_0 = arith.constant 0 : i32
    %c0_i32_1 = arith.constant 0 : i32
    return %c0_i32, %c0_i32_0 : i32, i32
  }
  func.func @transform_3(%arg0: i32) -> (i32, i32) {
    %c0_i32 = arith.constant 0 : i32
    %c0_i32_0 = arith.constant 0 : i32
    %c0_i32_1 = arith.constant 0 : i32
    return %c0_i32, %c0_i32_0 : i32, i32
  }
  func.func @transform_4(%arg0: i32) -> (i32, i32) {
    %c0_i32 = arith.constant 0 : i32
    %c0_i32_0 = arith.constant 0 : i32
    %c0_i32_1 = arith.constant 0 : i32
    return %c0_i32, %c0_i32_0 : i32, i32
  }
  func.func @transform_5(%arg0: i32) -> (i32, i32) {
    %c0_i32 = arith.constant 0 : i32
    %c0_i32_0 = arith.constant 0 : i32
    %c0_i32_1 = arith.constant 0 : i32
    return %c0_i32, %c0_i32_0 : i32, i32
  }
  func.func @transform_6(%arg0: i32) -> (i32, i32) {
    %c0_i32 = arith.constant 0 : i32
    %c0_i32_0 = arith.constant 0 : i32
    %c0_i32_1 = arith.constant 0 : i32
    return %c0_i32, %c0_i32_0 : i32, i32
  }
  func.func @transform_7(%arg0: i32) -> (i32, i32) {
    %c0_i32 = arith.constant 0 : i32
    %c0_i32_0 = arith.constant 0 : i32
    %c0_i32_1 = arith.constant 0 : i32
    return %c0_i32, %c0_i32_0 : i32, i32
  }
  func.func @transform_8(%arg0: i32) -> (i32, i32) {
    %c0_i32 = arith.constant 0 : i32
    %c0_i32_0 = arith.constant 0 : i32
    %c0_i32_1 = arith.constant 0 : i32
    return %c0_i32, %c0_i32_0 : i32, i32
  }
  func.func @transform_9(%arg0: i32) -> (i32, i32) {
    %c0_i32 = arith.constant 0 : i32
    %c0_i32_0 = arith.constant 0 : i32
    %c0_i32_1 = arith.constant 0 : i32
    return %c0_i32, %c0_i32_0 : i32, i32
  }
  func.func @transform_10(%arg0: i32) -> (i32, i32) {
    %c0_i32 = arith.constant 0 : i32
    %c0_i32_0 = arith.constant 0 : i32
    %c0_i32_1 = arith.constant 0 : i32
    return %c0_i32, %c0_i32_0 : i32, i32
  }
  func.func @transform_11(%arg0: i32) -> (i32, i32) {
    %c0_i32 = arith.constant 0 : i32
    %c0_i32_0 = arith.constant 0 : i32
    %c0_i32_1 = arith.constant 0 : i32
    return %c0_i32, %c0_i32_0 : i32, i32
  }
  func.func @transform_12(%arg0: i32) -> (i32, i32) {
    %c0_i32 = arith.constant 0 : i32
    %c0_i32_0 = arith.constant 0 : i32
    %c0_i32_1 = arith.constant 0 : i32
    return %c0_i32, %c0_i32_0 : i32, i32
  }
  func.func @transform_13(%arg0: i32) -> (i32, i32) {
    %c0_i32 = arith.constant 0 : i32
    %c0_i32_0 = arith.constant 0 : i32
    return %arg0, %c0_i32 : i32, i32
  }
}

</mosaic_0001>

<bundles_post_ra>
// kernel: tpu_custom_call.1
= control target key start
LH: loop header
LB: loop body
LE: loop exit
PB: predicated region body
PF: predicated region fallthrough
CT: control target
= control target key end

     0   :  { %s3062_s0 = inlined_call_operand.hbm [shape: f32[512,128], index: 0, kind: input, shape index: {}]   ;;  %s3063_s1 = inlined_call_operand.vmem [shape: f32[128,64], index: 1, kind: input, shape index: {}]   ;;  %s3064_s2 = inlined_call_operand.vmem [shape: f32[1,64], index: 2, kind: input, shape index: {}]   ;;  %s3065_s3 = inlined_call_operand.vmem [shape: f32[64,32], index: 3, kind: input, shape index: {}]   ;;  %s3066_s4 = inlined_call_operand.vmem [shape: f32[1,32], index: 4, kind: input, shape index: {}]   ;;  %s3067_s5 = inlined_call_operand.vmem [shape: f32[32,16], index: 5, kind: input, shape index: {}]   ;;  %s3068_s6 = inlined_call_operand.vmem [shape: f32[1,16], index: 6, kind: input, shape index: {}]   ;;  %s3069_s7 = inlined_call_operand.vmem [shape: f32[16,32], index: 7, kind: input, shape index: {}]   ;;  %s3070_s8 = inlined_call_operand.vmem [shape: f32[1,32], index: 8, kind: input, shape index: {}]   ;;  %s3071_s9 = inlined_call_operand.vmem [shape: f32[32,64], index: 9, kind: input, shape index: {}]   ;;  %s3072_s10 = inlined_call_operand.vmem [shape: f32[1,64], index: 10, kind: input, shape index: {}]   ;;  %s3073_s11 = inlined_call_operand.vmem [shape: f32[64,128], index: 11, kind: input, shape index: {}]   ;;  %s3074_s12 = inlined_call_operand.vmem [shape: f32[1,128], index: 12, kind: input, shape index: {}]   ;;  %s3075_s13 = inlined_call_operand.hbm [shape: f32[512,128], index: 13, kind: output, shape index: {}]  }
   0x1   :  { %3083 = sst [smem:[#allocation13_spill]] %s3062_s0 }
   0x2   :  { %18 = vsyncpa [#allocation3], 0 }
   0x3   :  { %20 = vsyncpa [#allocation3 + $0x1], 0 }
   0x4   :  { %21 = vsyncpa [#allocation4], 0 }
   0x5   :  { %23 = vsyncpa [#allocation4 + $0x1], 0  ;;  %s2619_s25 = smov 0   ;;  %s2621_s26 = smov 0  }
   0x6   :  { %s2623_s27 = smov 0   ;;  %s2625_s28 = smov 0  }
   0x7 LB: > { %3084 = sst [smem:[#allocation8_spill]] %s2529_s25  ;;  %s2640_s29 = sadd.s32 4294967295, %s2541_s28   ;;  %s2541_s28 = sphi %s2625_s28, %s3099_s28   ;;  %s2537_s27 = sphi %s2623_s27, %s3102_s27   ;;  %s2533_s26 = sphi %s2621_s26, %s3101_s26   ;;  %s2529_s25 = sphi %s2619_s25, %s3100_s25  }
   0x8   : > { %3085 = sst [smem:[#allocation9_spill]] %s2533_s26  ;;  %s1841_s30 = sadd.s32 4294967294, %s2541_s28  }
   0x9   : > { %3086 = sst [smem:[#allocation10_spill]] %s2537_s27  ;;  %s2644_s14 = sadd.s32 1, %s2541_s28  }
   0xa   : > { %3087 = sst [smem:[#allocation11_spill]] %s2644_s14  ;;  %s36_s15 = sadd.s32 1, %s2537_s27 }
   0xb   : > { %s33_s16 = ssub.s32 %s2541_s28, %s2644_s14  ;;  %p43_p0 = scmp.ne.s32.totalorder %s2537_s27, %s2533_s26 }
   0xc   : > { %p34_p1 = scmp.eq.s32.totalorder %s33_s16, 0  ;;  %p44_p2 = scmp.eq.s32.totalorder %s2541_s28, 0 }
   0xd   : > { %p49_p3 = scmp.ne.s32.totalorder %s2533_s26, %s2529_s25  ;;  %p50_p4 = scmp.eq.s32.totalorder %s2640_s29, 0 }
   0xe   : > { %s2656_s17 = scalar_select %p34_p1, %s2537_s27, %s36_s15  }
   0xf   : > { %p2658_p5 = por %p44_p2, %p43_p0  ;;  %p2662_p6 = por %p50_p4, %p49_p3 }
  0x10   : > { %3088 = sst [smem:[#allocation12_spill]] %s2656_s17  ;;  %p325_p7 = scmp.eq.s32.totalorder %s2640_s29, 3 }
  0x11   : > { %p331_p8 = scmp.eq.s32.totalorder %s1841_s30, 3  ;;  %p2407_p9 = scmp.lt.s32.totalorder %s2541_s28, 4 }
  0x12   : > { %p2668_p10 = por %p325_p7, %p43_p0  ;;  %s387_s22 = sand.u32 1, %s2537_s27  }
  0x13   : > { %p2672_p11 = por %p331_p8, %p49_p3  ;;  %s1941_s23 = sshll.u32 %s2541_s28, 11 }
  0x14   : > { %s3091_s20 = scalar_select %p2668_p10, 1, 0 }
  0x15   : > { %s3092_s21 = scalar_select %p2672_p11, 1, 0 }
  0x16   : > { %s1844_s24 = sshll.u32 %s387_s22, 7  ;;  %s3093_s0 = sld [smem:[#allocation13_spill]] }
  0x17   : > { %s391_s30 = scalar_lea.vmem [#allocation2], %s1844_s24  ;;  %p2685_p12 = pnand %p2407_p9, %p2658_p5 }
  0x18   : > { %s398_s14 = sshll.u32 %s391_s30, 4  ;;  %s2691_s27 = scalar_lea.sflag [#allocation3], %s387_s22  ;;  %s2689_s14 = int_to_ptr.vmem [resolvable:$true] %s398_s14 }
  0x19   : > { %p2447_p0 = pneg %p2685_p12 }
  0x1c   : > { %s2681_s17 = scalar_lea.hbm %s3093_s0, %s1941_s23  ;;  %s2450_s24 = scalar_lea.hbm %s3093_s0, 8192 }
  0x1d   : > { %s2445_s15 = scalar_lea.hbm %s2681_s17, 2048  ;;  %p2451_p3 = scmp.lt.u32.totalorder %s2681_s17, %s3093_s0 }
  0x1e   : > { %p2446_p13 = scmp.ne.s32.totalorder %s2681_s17, %s2445_s15  ;;  %p2452_p4 = scmp.lt.u32.totalorder %s2450_s24, %s2445_s15 }
  0x1f   : > { %p2454_p7 = scmp.lt.u32.totalorder %s2445_s15, %s2681_s17 }
  0x20   : > { %p2448_p1 = pnand %p2447_p0, %p2446_p13  ;;  %p2453_p5 = por %p2452_p4, %p2451_p3 }
  0x22   : > { %p2449_p2 = pneg %p2448_p1  ;;  %p2455_p8 = por %p2454_p7, %p2453_p5 }
  0x24   : > { %p2456_p9 = pnand %p2455_p8, %p2449_p2 }
  0x26   : > { %2459 = shalt.err (!%p2456_p9)
}
  0x27   : > { %s2460_s22 = scalar_lea.vmem %s2689_s14, 2048  ;;  %s2543_s23 = smov [#allocation2]  }
  0x28   : > { %p2461_p13 = scmp.ne.s32.totalorder %s2689_s14, %s2460_s22  ;;  %s2465_s18 = sshll.u32 %s2543_s23, 4  ;;  %s2466_s18 = int_to_ptr.vmem [resolvable:$false] %s2465_s18 }
  0x29   : > { %s2467_s16 = scalar_lea.vmem %s2466_s18, 4096  ;;  %p2468_p10 = scmp.lt.s32.totalorder %s2689_s14, %s2466_s18 }
  0x2a   : > { %p2463_p1 = pnand %p2461_p13, %p2447_p0  ;;  %p2469_p3 = scmp.lt.s32.totalorder %s2467_s16, %s2460_s22 }
  0x2c   : > { %p2464_p11 = pneg %p2463_p1  ;;  %p2470_p4 = por %p2469_p3, %p2468_p10 }
  0x2e   : > { %p2471_p5 = pnand %p2470_p4, %p2464_p11 }
  0x30   : > { %2474 = shalt.err (!%p2471_p5)
}
  0x31   : > { %s2544_s15 = smov 128   ;;  %s2545_s24 = smov 8  }
  0x32   : > { %2402 = dma.hbm_to_vmem [thread:$0]  (!%p2685_p12), %s2681_s17, 2048, %s2689_s14, %s2691_s27, %s2544_s15, %s2544_s15, %s2545_s24  }
  0x33   : > { %p1847_p0 = scmp.ge.s32.totalorder %s2541_s28, 1  ;;  %p406_p2 = scmp.lt.s32.totalorder %s2541_s28, 5 }
  0x35   : > { %p407_p7 = pnand %p1847_p0, %p406_p2 }
  0x36   : > { %s2722_s30 = sand.u32 (!%p407_p7), 1, %s2533_s26  }
  0x37   : > { %410 = sbr.rel (%p407_p7) target bundleno = 1444 (0x5a4), region = 72  ;;  %s3081_s22 = sshll.u32 (!%p407_p7), %s2722_s30, 7 }
  0x38   : > { %s413_s23 = scalar_lea.sflag (!%p407_p7), [#allocation3], %s2722_s30  ;;  %s2728_s18 = scalar_lea.vmem (!%p407_p7), [#allocation2], %s3081_s22 }
  0x3e   : > { %2520 = dma.done.wait (%p2662_p6), %s413_s23, 2048  }
  0x3f   : > { %2522 = vsyncadd (%p2662_p6), %s413_s23, 4294965248  ;;  %v477_v0 = vld [vmem:[%s3063_s1] sm:$0xff]  ;;  %v478_v1 = vld [vmem:[%s3063_s1 + $0x8] sm:$0xff]  ;;  %vm676_vm0 = vcmask 523264   ;;  %vm897_vm1 = vcmask 261120   ;;  %vm1100_vm2 = vcmask 130048  }
  0x40   : > { %v479_v2 = vld [vmem:[%s3063_s1 + $0x10] sm:$0xff]  ;;  %v2309_v3 = vpack.c.bf16 %v478_v1, %v477_v0  ;;  %v480_v4 = vld [vmem:[%s3063_s1 + $0x18] sm:$0xff]  ;;  %v481_v6 = vld [vmem:[%s3063_s1 + $0x20] sm:$0xff]  ;;  %s3095_s25 = sshll.u32 %s2722_s30, 7  ;;  %s1942_s14 = sshll.u32 %s2640_s29, 11 }
  0x41   : > { %v2313_v5 = vpack.c.bf16 %v480_v4, %v479_v2  ;;  %v482_v7 = vld [vmem:[%s3063_s1 + $0x28] sm:$0xff]  ;;  %v461_v9 = vld [vmem:[%s2728_s18] sm:$0xff]  ;;  %v483_v10 = vld [vmem:[%s3063_s1 + $0x30] sm:$0xff]  ;;  %s2994_s27 = scalar_lea.vmem [#allocation5], %s3095_s25  ;;  %s3015_s22 = scalar_lea.hbm %s3075_s13, %s1942_s14 }
  0x42   : > { %2310 = vmatprep.subr.bf16.mxu0 %v2309_v3  ;;  %v2317_v8 = vpack.c.bf16 %v482_v7, %v481_v6  ;;  %v484_v11 = vld [vmem:[%s3063_s1 + $0x38] sm:$0xff]  ;;  %2113 = vmatprep.mubr.f32.mxu0 %v461_v9  ;;  %v485_v13 = vld [vmem:[%s3063_s1 + $0x40] sm:$0xff]  ;;  %v486_v14 = vld [vmem:[%s3063_s1 + $0x48] sm:$0xff]  ;;  %s1768_s0 = sshll.u32 %s2994_s27, 4  ;;  %s1755_s29 = scalar_lea.sflag [#allocation4], %s2722_s30  ;;  %s3017_s0 = int_to_ptr.vmem [resolvable:$true] %s1768_s0 }
  0x43   : > { %2312 = vmatpush3.bf16.msra.mxu0 %v2309_v3  ;;  %v2321_v12 = vpack.c.bf16 %v484_v11, %v483_v10  ;;  %v661_v15 = vld [vmem:[%s3065_s3] sm:$0xff]  ;;  %v662_v16 = vld [vmem:[%s3065_s3 + $0x8] sm:$0xff]  ;;  %v663_v17 = vld [vmem:[%s3065_s3 + $0x10] sm:$0xff]  ;;  %v2325_v21 = vpack.c.bf16 %v486_v14, %v485_v13  ;;  %s2475_s16 = scalar_lea.vmem %s3017_s0, 2048  ;;  %p3096_p10 = scmp.ne.s32.totalorder %s3091_s20, 0 }
  0x44   : > { %2314 = vmatprep.subr.bf16.mxu0 %v2313_v5  ;;  %v664_v18 = vld [vmem:[%s3065_s3 + $0x18] sm:$0xff]  ;;  %v2341_v19 = vpack.c.bf16 %v662_v16, %v661_v15  ;;  %v665_v22 = vld [vmem:[%s3065_s3 + $0x20] sm:$0xff]  ;;  %v666_v23 = vld [vmem:[%s3065_s3 + $0x28] sm:$0xff]  ;;  %p2476_p6 = scmp.ne.s32.totalorder %s3017_s0, %s2475_s16 }
  0x45   : > { %v2345_v20 = vpack.c.bf16 %v664_v18, %v663_v17  ;;  %v487_v24 = vld [vmem:[%s3063_s1 + $0x50] sm:$0xff]  ;;  %v488_v25 = vld [vmem:[%s3063_s1 + $0x58] sm:$0xff]  ;;  %v2349_v26 = vpack.c.bf16 %v666_v23, %v665_v22  ;;  %v489_v28 = vld [vmem:[%s3063_s1 + $0x60] sm:$0xff] }
  0x46   : > { %2342 = vmatprep.subr.bf16.mxu1 %v2341_v19  ;;  %v2329_v27 = vpack.c.bf16 %v488_v25, %v487_v24  ;;  %v490_v29 = vld [vmem:[%s3063_s1 + $0x68] sm:$0xff]  ;;  %v491_v31 = vld [vmem:[%s3063_s1 + $0x70] sm:$0xff]  ;;  %v492_v32 = vld [vmem:[%s3063_s1 + $0x78] sm:$0xff]  ;;  %p2477_p11 = pnand %p2476_p6, %p3096_p10 }
  0x47   : > { %2316 = vmatpush3.bf16.msra.mxu0 %v2313_v5  ;;  %2344 = vmatpush3.bf16.msra.mxu1 %v2341_v19  ;;  %v2333_v30 = vpack.c.bf16 %v490_v29, %v489_v28  ;;  %v2337_v33 = vpack.c.bf16 %v492_v32, %v491_v31  ;;  %v462_v34 = vld [vmem:[%s2728_s18 + $0x8] sm:$0xff]  ;;  %v463_v35 = vld [vmem:[%s2728_s18 + $0x10] sm:$0xff]  ;;  %v464_v36 = vld [vmem:[%s2728_s18 + $0x18] sm:$0xff] }
  0x48   : > { %2318 = vmatprep.subr.bf16.mxu0 %v2317_v8  ;;  %2346 = vmatprep.subr.bf16.mxu1 %v2345_v20  ;;  %v465_v37 = vld [vmem:[%s2728_s18 + $0x20] sm:$0xff]  ;;  %v466_v38 = vld [vmem:[%s2728_s18 + $0x28] sm:$0xff]  ;;  %v467_v39 = vld [vmem:[%s2728_s18 + $0x30] sm:$0xff]  ;;  %p2478_p12 = pneg %p2477_p11 }
  0x49   : > { %v468_v40 = vld [vmem:[%s2728_s18 + $0x38] sm:$0xff]  ;;  %v469_v41 = vld [vmem:[%s2728_s18 + $0x40] sm:$0xff]  ;;  %v470_v42 = vld [vmem:[%s2728_s18 + $0x48] sm:$0xff] }
  0x4a   : > { %v471_v43 = vld [vmem:[%s2728_s18 + $0x50] sm:$0xff]  ;;  %v472_v44 = vld [vmem:[%s2728_s18 + $0x58] sm:$0xff]  ;;  %v473_v45 = vld [vmem:[%s2728_s18 + $0x60] sm:$0xff] }
  0x4b   : > { %2320 = vmatpush3.bf16.msra.mxu0 %v2317_v8  ;;  %2348 = vmatpush3.bf16.msra.mxu1 %v2345_v20  ;;  %v474_v46 = vld [vmem:[%s2728_s18 + $0x68] sm:$0xff]  ;;  %v475_v47 = vld [vmem:[%s2728_s18 + $0x70] sm:$0xff]  ;;  %v476_v48 = vld [vmem:[%s2728_s18 + $0x78] sm:$0xff]  ;;  %s2546_s18 = smov [#allocation5]  }
  0x4c   : > { %2322 = vmatprep.subr.bf16.mxu0 %v2321_v12  ;;  %2350 = vmatprep.subr.bf16.mxu1 %v2349_v26  ;;  %v667_v49 = vld [vmem:[%s3065_s3 + $0x30] sm:$0xff]  ;;  %v668_v50 = vld [vmem:[%s3065_s3 + $0x38] sm:$0xff]  ;;  %v886_v52 = vld [vmem:[%s3067_s5] sm:$0xff]  ;;  %s2479_s15 = sshll.u32 %s2546_s18, 4  ;;  %s2480_s15 = int_to_ptr.vmem [resolvable:$false] %s2479_s15 }
  0x4d   : > { %v2353_v51 = vpack.c.bf16 %v668_v50, %v667_v49  ;;  %v887_v53 = vld [vmem:[%s3067_s5 + $0x8] sm:$0xff]  ;;  %v2831_v55 = vld [vmem:[%s3064_s2] ss:$0 sm:$0xff]  ;;  %v888_v60 = vld [vmem:[%s3067_s5 + $0x10] sm:$0xff]  ;;  %s2481_s24 = scalar_lea.vmem %s2480_s15, 4096  ;;  %p2482_p8 = scmp.lt.s32.totalorder %s3017_s0, %s2480_s15 }
  0x4e   : > { %v2357_v54 = vpack.c.bf16 %v887_v53, %v886_v52  ;;  %v889_v61 = vld [vmem:[%s3067_s5 + $0x18] sm:$0xff]  ;;  %p2483_p9 = scmp.lt.s32.totalorder %s2481_s24, %s2475_s16 }
  0x4f   : > { %2324 = vmatpush3.bf16.msra.mxu0 %v2321_v12  ;;  %2352 = vmatpush3.bf16.msra.mxu1 %v2349_v26  ;;  %v2361_v3 = vpack.c.bf16 %v889_v61, %v888_v60 }
  0x50   : > { %2326 = vmatprep.subr.bf16.mxu0 %v2325_v21  ;;  %2354 = vmatprep.subr.bf16.mxu1 %v2353_v51  ;;  %p2484_p13 = por %p2483_p9, %p2482_p8 }
  0x52   : > { %p2485_p1 = pnand %p2484_p13, %p2478_p12 }
  0x53   : > { %2328 = vmatpush3.bf16.msra.mxu0 %v2325_v21  ;;  %2356 = vmatpush3.bf16.msra.mxu1 %v2353_v51 }
  0x54   : > { %2330 = vmatprep.subr.bf16.mxu0 %v2329_v27  ;;  %2358 = vmatprep.subr.bf16.mxu1 %v2357_v54 }
  0x57   : > { %2332 = vmatpush3.bf16.msra.mxu0 %v2329_v27 }
  0x58   : > { %2334 = vmatprep.subr.bf16.mxu0 %v2333_v30 }
  0x5b   : > { %2336 = vmatpush3.bf16.msra.mxu0 %v2333_v30 }
  0x5c   : > { %2338 = vmatprep.subr.bf16.mxu0 %v2337_v33 }
  0x5f   : > { %2340 = vmatpush3.bf16.msra.mxu0 %v2337_v33 }
  0x62   : > { %2114 = vmatmul.mubr.f32.vlgmr.msra.gmra.mrb[0].mxu0 %v462_v34 }
  0x63   : > { %2116 = vmatprep.mubr.f32.mxu0 %v463_v35 }
  0x66   : > { %2117 = vmatmul.mubr.f32.gmra.mrb[2].mxu0 %v464_v36 }
  0x67   : > { %2119 = vmatprep.mubr.f32.mxu0 %v465_v37 }
  0x6a   : > { %2120 = vmatmul.mubr.f32.gmra.mrb[4].mxu0 %v466_v38 }
  0x6b   : > { %2122 = vmatprep.mubr.f32.mxu0 %v467_v39 }
  0x6e   : > { %2123 = vmatmul.mubr.f32.gmra.mrb[6].mxu0 %v468_v40 }
  0x6f   : > { %2125 = vmatprep.mubr.f32.mxu0 %v469_v41 }
  0x72   : > { %2126 = vmatmul.mubr.f32.gmra.mrb[8].mxu0 %v470_v42 }
  0x73   : > { %2128 = vmatprep.mubr.f32.mxu0 %v471_v43  ;;  %v1091_v43 = vld [vmem:[%s3069_s7] sm:$0xff] }
  0x76   : > { %2129 = vmatmul.mubr.f32.gmra.mrb[10].mxu0 %v472_v44  ;;  %v1092_v44 = vld [vmem:[%s3069_s7 + $0x8] sm:$0xff] }
  0x77   : > { %2131 = vmatprep.mubr.f32.mxu0 %v473_v45  ;;  %v2365_v45 = vpack.c.bf16 %v1092_v44, %v1091_v43 }
  0x79   : > { %2366 = vmatprep.subr.bf16.mxu0 %v2365_v45 }
  0x7a   : > { %2132 = vmatmul.mubr.f32.gmra.mrb[12].mxu0 %v474_v46  ;;  %v1851_v46 = vld [vmem:[%s3066_s4] ss:$0 sm:$0xff] }
  0x7b   : > { %2134 = vmatprep.mubr.f32.mxu0 %v475_v47  ;;  %2368 = vmatpush3.bf16.msra.mxu0 %v2365_v45 }
  0x7e   : > { %2135 = vmatmul.mubr.f32.gmra.mrb[14].mxu0 %v476_v48 }
 0x135   : > { %v2115_v56 = vpop.f32.mrb[0].mxu0 }
 0x136   : > { %v572_v57 = vadd.f32 %v2115_v56, %v2831_v55  ;;  %v566_v58 = vpop.f32.mrb[1].mxu0 }
 0x137   : > { %v567_v59 = vadd.f32 %v2831_v55, %v566_v58 }
 0x138   : > { %v646_v0 = vmax.f32 %v572_v57, 0.0 }
 0x139   : > { %v645_v62 = vmax.f32 %v567_v59, 0.0  ;;  %v2118_v63 = vpop.f32.mrb[2].mxu0 }
 0x13a   : > { %v582_v1 = vadd.f32 %v2118_v63, %v2831_v55  ;;  %v576_v2 = vpop.f32.mrb[3].mxu0 }
 0x13b   : > { %v577_v4 = vadd.f32 %v2831_v55, %v576_v2  ;;  %2153 = vmatprep.mubr.msk.f32.mxu1 %vm676_vm0, %v645_v62 }
 0x13c   : > { %2154 = vmatmul.mubr.msk.f32.vlgmr.msra.gmra.mrb[0].mxu1 %vm676_vm0, %v646_v0  ;;  %v648_v7 = vmax.f32 %v582_v1, 0.0 }
 0x13d   : > { %v647_v5 = vmax.f32 %v577_v4, 0.0  ;;  %v2121_v6 = vpop.f32.mrb[4].mxu0  ;;  %2360 = vmatpush3.bf16.msra.mxu1 %v2357_v54 }
 0x13e   : > { %v592_v8 = vadd.f32 %v2121_v6, %v2831_v55  ;;  %v586_v9 = vpop.f32.mrb[5].mxu0  ;;  %2362 = vmatprep.subr.bf16.mxu1 %v2361_v3 }
 0x13f   : > { %v587_v10 = vadd.f32 %v2831_v55, %v586_v9  ;;  %2156 = vmatprep.mubr.msk.f32.mxu1 %vm676_vm0, %v647_v5 }
 0x140   : > { %2157 = vmatmul.mubr.msk.f32.gmra.mrb[2].mxu1 %vm676_vm0, %v648_v7  ;;  %v650_v13 = vmax.f32 %v592_v8, 0.0 }
 0x141   : > { %v649_v11 = vmax.f32 %v587_v10, 0.0  ;;  %v2124_v12 = vpop.f32.mrb[6].mxu0  ;;  %2364 = vmatpush3.bf16.msra.mxu1 %v2361_v3 }
 0x142   : > { %v602_v14 = vadd.f32 %v2124_v12, %v2831_v55  ;;  %v596_v15 = vpop.f32.mrb[7].mxu0  ;;  %2393 = vmatprep.subr.bf16.mxu1 %v2365_v45 }
 0x143   : > { %v597_v16 = vadd.f32 %v2831_v55, %v596_v15  ;;  %2159 = vmatprep.mubr.msk.f32.mxu1 %vm676_vm0, %v649_v11 }
 0x144   : > { %2160 = vmatmul.mubr.msk.f32.gmra.mrb[4].mxu1 %vm676_vm0, %v650_v13  ;;  %v652_v19 = vmax.f32 %v602_v14, 0.0 }
 0x145   : > { %v651_v17 = vmax.f32 %v597_v16, 0.0  ;;  %v2127_v18 = vpop.f32.mrb[8].mxu0 }
 0x146   : > { %v612_v20 = vadd.f32 %v2127_v18, %v2831_v55  ;;  %v606_v21 = vpop.f32.mrb[9].mxu0 }
 0x147   : > { %v607_v22 = vadd.f32 %v2831_v55, %v606_v21  ;;  %2162 = vmatprep.mubr.msk.f32.mxu1 %vm676_vm0, %v651_v17 }
 0x148   : > { %2163 = vmatmul.mubr.msk.f32.gmra.mrb[6].mxu1 %vm676_vm0, %v652_v19  ;;  %v654_v25 = vmax.f32 %v612_v20, 0.0 }
 0x149   : > { %v653_v23 = vmax.f32 %v607_v22, 0.0  ;;  %v2130_v24 = vpop.f32.mrb[10].mxu0 }
 0x14a   : > { %v622_v26 = vadd.f32 %v2130_v24, %v2831_v55  ;;  %v616_v27 = vpop.f32.mrb[11].mxu0 }
 0x14b   : > { %v617_v28 = vadd.f32 %v2831_v55, %v616_v27  ;;  %2165 = vmatprep.mubr.msk.f32.mxu1 %vm676_vm0, %v653_v23 }
 0x14c   : > { %2166 = vmatmul.mubr.msk.f32.gmra.mrb[8].mxu1 %vm676_vm0, %v654_v25  ;;  %v656_v31 = vmax.f32 %v622_v26, 0.0 }
 0x14d   : > { %v655_v29 = vmax.f32 %v617_v28, 0.0  ;;  %v2133_v30 = vpop.f32.mrb[12].mxu0 }
 0x14e   : > { %v632_v32 = vadd.f32 %v2133_v30, %v2831_v55  ;;  %v626_v33 = vpop.f32.mrb[13].mxu0 }
 0x14f   : > { %v627_v34 = vadd.f32 %v2831_v55, %v626_v33  ;;  %2168 = vmatprep.mubr.msk.f32.mxu1 %vm676_vm0, %v655_v29 }
 0x150   : > { %2169 = vmatmul.mubr.msk.f32.gmra.mrb[10].mxu1 %vm676_vm0, %v656_v31  ;;  %v658_v37 = vmax.f32 %v632_v32, 0.0  ;;  %v1310_v31 = vld [vmem:[%s3071_s9] sm:$0xff]  ;;  %v1311_v32 = vld [vmem:[%s3071_s9 + $0x8] sm:$0xff] }
 0x151   : > { %v657_v35 = vmax.f32 %v627_v34, 0.0  ;;  %v2136_v36 = vpop.f32.mrb[14].mxu0  ;;  %v2369_v33 = vpack.c.bf16 %v1311_v32, %v1310_v31  ;;  %v1868_v34 = vld [vmem:[%s3068_s6] ss:$0 sm:$0xff] }
 0x152   : > { %v642_v38 = vadd.f32 %v2136_v36, %v2831_v55  ;;  %v636_v39 = vpop.f32.mrb[15].mxu0 }
 0x153   : > { %v637_v40 = vadd.f32 %v2831_v55, %v636_v39  ;;  %2171 = vmatprep.mubr.msk.f32.mxu1 %vm676_vm0, %v657_v35 }
 0x154   : > { %2172 = vmatmul.mubr.msk.f32.gmra.mrb[12].mxu1 %vm676_vm0, %v658_v37  ;;  %v660_v42 = vmax.f32 %v642_v38, 0.0 }
 0x155   : > { %v659_v41 = vmax.f32 %v637_v40, 0.0 }
 0x157   : > { %2174 = vmatprep.mubr.msk.f32.mxu1 %vm676_vm0, %v659_v41 }
 0x158   : > { %2175 = vmatmul.mubr.msk.f32.gmra.mrb[14].mxu1 %vm676_vm0, %v660_v42 }
 0x20f   : > { %v2155_v47 = vpop.f32.mrb[0].mxu1 }
 0x210   : > { %v797_v48 = vadd.f32 %v2155_v47, %v1851_v46  ;;  %v791_v49 = vpop.f32.mrb[1].mxu1 }
 0x211   : > { %v792_v50 = vadd.f32 %v1851_v46, %v791_v49 }
 0x212   : > { %v871_v53 = vmax.f32 %v797_v48, 0.0 }
 0x213   : > { %v870_v51 = vmax.f32 %v792_v50, 0.0  ;;  %v2158_v52 = vpop.f32.mrb[2].mxu1 }
 0x214   : > { %v807_v54 = vadd.f32 %v2158_v52, %v1851_v46  ;;  %v801_v55 = vpop.f32.mrb[3].mxu1 }
 0x215   : > { %v802_v56 = vadd.f32 %v1851_v46, %v801_v55  ;;  %2185 = vmatprep.mubr.msk.f32.mxu1 %vm897_vm1, %v870_v51 }
 0x216   : > { %2186 = vmatmul.mubr.msk.f32.vlgmr.msra.gmra.mrb[16].mxu1 %vm897_vm1, %v871_v53  ;;  %v873_v59 = vmax.f32 %v807_v54, 0.0 }
 0x217   : > { %v872_v57 = vmax.f32 %v802_v56, 0.0  ;;  %v2161_v58 = vpop.f32.mrb[4].mxu1  ;;  %2394 = vmatpush3.bf16.msra.mxu1 %v2365_v45 }
 0x218   : > { %v817_v60 = vadd.f32 %v2161_v58, %v1851_v46  ;;  %v811_v61 = vpop.f32.mrb[5].mxu1  ;;  %2370 = vmatprep.subr.bf16.mxu1 %v2369_v33 }
 0x219   : > { %v812_v62 = vadd.f32 %v1851_v46, %v811_v61  ;;  %2188 = vmatprep.mubr.msk.f32.mxu1 %vm897_vm1, %v872_v57 }
 0x21a   : > { %2189 = vmatmul.mubr.msk.f32.gmra.mrb[18].mxu1 %vm897_vm1, %v873_v59  ;;  %v875_v1 = vmax.f32 %v817_v60, 0.0 }
 0x21b   : > { %v874_v63 = vmax.f32 %v812_v62, 0.0  ;;  %v2164_v0 = vpop.f32.mrb[6].mxu1 }
 0x21c   : > { %v827_v2 = vadd.f32 %v2164_v0, %v1851_v46  ;;  %v821_v3 = vpop.f32.mrb[7].mxu1 }
 0x21d   : > { %v822_v4 = vadd.f32 %v1851_v46, %v821_v3  ;;  %2191 = vmatprep.mubr.msk.f32.mxu1 %vm897_vm1, %v874_v63  ;;  %v1312_v3 = vld [vmem:[%s3071_s9 + $0x10] sm:$0xff] }
 0x21e   : > { %2192 = vmatmul.mubr.msk.f32.gmra.mrb[20].mxu1 %vm897_vm1, %v875_v1  ;;  %v877_v7 = vmax.f32 %v827_v2, 0.0 }
 0x21f   : > { %v876_v5 = vmax.f32 %v822_v4, 0.0  ;;  %v2167_v6 = vpop.f32.mrb[8].mxu1  ;;  %v1313_v4 = vld [vmem:[%s3071_s9 + $0x18] sm:$0xff] }
 0x220   : > { %v837_v8 = vadd.f32 %v2167_v6, %v1851_v46  ;;  %v831_v9 = vpop.f32.mrb[9].mxu1  ;;  %v1530_v6 = vld [vmem:[%s3073_s11] sm:$0xff] }
 0x221   : > { %v832_v10 = vadd.f32 %v1851_v46, %v831_v9  ;;  %2194 = vmatprep.mubr.msk.f32.mxu1 %vm897_vm1, %v876_v5  ;;  %v2373_v5 = vpack.c.bf16 %v1313_v4, %v1312_v3  ;;  %v1902_v3 = vld [vmem:[%s3072_s10] ss:$0 sm:$0xff] }
 0x222   : > { %2195 = vmatmul.mubr.msk.f32.gmra.mrb[22].mxu1 %vm897_vm1, %v877_v7  ;;  %v879_v13 = vmax.f32 %v837_v8, 0.0  ;;  %v1531_v7 = vld [vmem:[%s3073_s11 + $0x8] sm:$0xff]  ;;  %v1532_v8 = vld [vmem:[%s3073_s11 + $0x10] sm:$0xff] }
 0x223   : > { %v878_v11 = vmax.f32 %v832_v10, 0.0  ;;  %v2170_v12 = vpop.f32.mrb[10].mxu1  ;;  %v2377_v9 = vpack.c.bf16 %v1531_v7, %v1530_v6  ;;  %v1533_v10 = vld [vmem:[%s3073_s11 + $0x18] sm:$0xff] }
 0x224   : > { %v847_v14 = vadd.f32 %v2170_v12, %v1851_v46  ;;  %v841_v15 = vpop.f32.mrb[11].mxu1  ;;  %v1534_v12 = vld [vmem:[%s3073_s11 + $0x20] sm:$0xff] }
 0x225   : > { %v842_v16 = vadd.f32 %v1851_v46, %v841_v15  ;;  %2197 = vmatprep.mubr.msk.f32.mxu1 %vm897_vm1, %v878_v11  ;;  %v2381_v11 = vpack.c.bf16 %v1533_v10, %v1532_v8  ;;  %2378 = vmatprep.subr.bf16.mxu0 %v2377_v9  ;;  %v1885_v15 = vld [vmem:[%s3070_s8] ss:$0 sm:$0xff] }
 0x226   : > { %2198 = vmatmul.mubr.msk.f32.gmra.mrb[24].mxu1 %vm897_vm1, %v879_v13  ;;  %v881_v19 = vmax.f32 %v847_v14, 0.0  ;;  %v1535_v13 = vld [vmem:[%s3073_s11 + $0x28] sm:$0xff] }
 0x227   : > { %v880_v17 = vmax.f32 %v842_v16, 0.0  ;;  %v2173_v18 = vpop.f32.mrb[12].mxu1  ;;  %v2385_v14 = vpack.c.bf16 %v1535_v13, %v1534_v12 }
 0x228   : > { %v857_v20 = vadd.f32 %v2173_v18, %v1851_v46  ;;  %v851_v21 = vpop.f32.mrb[13].mxu1 }
 0x229   : > { %v852_v22 = vadd.f32 %v1851_v46, %v851_v21  ;;  %2200 = vmatprep.mubr.msk.f32.mxu1 %vm897_vm1, %v880_v17 }
 0x22a   : > { %2201 = vmatmul.mubr.msk.f32.gmra.mrb[26].mxu1 %vm897_vm1, %v881_v19  ;;  %v883_v25 = vmax.f32 %v857_v20, 0.0 }
 0x22b   : > { %v882_v23 = vmax.f32 %v852_v22, 0.0  ;;  %v2176_v24 = vpop.f32.mrb[14].mxu1 }
 0x22c   : > { %v867_v26 = vadd.f32 %v2176_v24, %v1851_v46  ;;  %v861_v27 = vpop.f32.mrb[15].mxu1 }
 0x22d   : > { %v862_v28 = vadd.f32 %v1851_v46, %v861_v27  ;;  %2203 = vmatprep.mubr.msk.f32.mxu1 %vm897_vm1, %v882_v23 }
 0x22e   : > { %2204 = vmatmul.mubr.msk.f32.gmra.mrb[28].mxu1 %vm897_vm1, %v883_v25  ;;  %v885_v30 = vmax.f32 %v867_v26, 0.0 }
 0x22f   : > { %v884_v29 = vmax.f32 %v862_v28, 0.0 }
 0x231   : > { %2206 = vmatprep.mubr.msk.f32.mxu1 %vm897_vm1, %v884_v29 }
 0x232   : > { %2207 = vmatmul.mubr.msk.f32.gmra.mrb[30].mxu1 %vm897_vm1, %v885_v30 }
 0x2e9   : > { %v2187_v35 = vpop.f32.mrb[16].mxu1 }
 0x2ea   : > { %v1012_v36 = vpop.f32.mrb[17].mxu1  ;;  %v1018_v38 = vadd.f32 %v2187_v35, %v1868_v34 }
 0x2eb   : > { %v1013_v37 = vadd.f32 %v1868_v34, %v1012_v36 }
 0x2ed   : > { %v2190_v39 = vpop.f32.mrb[18].mxu1  ;;  %2213 = vmatprep.mubr.msk.f32.mxu0 %vm1100_vm2, %v1013_v37 }
 0x2ee   : > { %v1022_v40 = vpop.f32.mrb[19].mxu1  ;;  %2214 = vmatmul.mubr.msk.f32.vlgmr.msra.gmra.mrb[16].mxu0 %vm1100_vm2, %v1018_v38  ;;  %v1028_v42 = vadd.f32 %v2190_v39, %v1868_v34 }
 0x2ef   : > { %v1023_v41 = vadd.f32 %v1868_v34, %v1022_v40  ;;  %2380 = vmatpush3.bf16.msra.mxu0 %v2377_v9 }
 0x2f0   : > { %2382 = vmatprep.subr.bf16.mxu0 %v2381_v11 }
 0x2f1   : > { %v2193_v43 = vpop.f32.mrb[20].mxu1  ;;  %2216 = vmatprep.mubr.msk.f32.mxu0 %vm1100_vm2, %v1023_v41 }
 0x2f2   : > { %v1032_v44 = vpop.f32.mrb[21].mxu1  ;;  %2217 = vmatmul.mubr.msk.f32.gmra.mrb[18].mxu0 %vm1100_vm2, %v1028_v42  ;;  %v1038_v46 = vadd.f32 %v2193_v43, %v1868_v34 }
 0x2f3   : > { %v1033_v45 = vadd.f32 %v1868_v34, %v1032_v44  ;;  %2384 = vmatpush3.bf16.msra.mxu0 %v2381_v11 }
 0x2f4   : > { %2386 = vmatprep.subr.bf16.mxu0 %v2385_v14 }
 0x2f5   : > { %v2196_v47 = vpop.f32.mrb[22].mxu1  ;;  %2219 = vmatprep.mubr.msk.f32.mxu0 %vm1100_vm2, %v1033_v45 }
 0x2f6   : > { %v1042_v48 = vpop.f32.mrb[23].mxu1  ;;  %2220 = vmatmul.mubr.msk.f32.gmra.mrb[20].mxu0 %vm1100_vm2, %v1038_v46  ;;  %v1048_v50 = vadd.f32 %v2196_v47, %v1868_v34 }
 0x2f7   : > { %v1043_v49 = vadd.f32 %v1868_v34, %v1042_v48  ;;  %2388 = vmatpush3.bf16.msra.mxu0 %v2385_v14 }
 0x2f9   : > { %v2199_v51 = vpop.f32.mrb[24].mxu1  ;;  %2222 = vmatprep.mubr.msk.f32.mxu0 %vm1100_vm2, %v1043_v49 }
 0x2fa   : > { %v1052_v52 = vpop.f32.mrb[25].mxu1  ;;  %2223 = vmatmul.mubr.msk.f32.gmra.mrb[22].mxu0 %vm1100_vm2, %v1048_v50  ;;  %v1058_v54 = vadd.f32 %v2199_v51, %v1868_v34 }
 0x2fb   : > { %v1053_v53 = vadd.f32 %v1868_v34, %v1052_v52 }
 0x2fd   : > { %v2202_v55 = vpop.f32.mrb[26].mxu1  ;;  %2225 = vmatprep.mubr.msk.f32.mxu0 %vm1100_vm2, %v1053_v53 }
 0x2fe   : > { %v1062_v56 = vpop.f32.mrb[27].mxu1  ;;  %2226 = vmatmul.mubr.msk.f32.gmra.mrb[24].mxu0 %vm1100_vm2, %v1058_v54  ;;  %v1068_v58 = vadd.f32 %v2202_v55, %v1868_v34 }
 0x2ff   : > { %v1063_v57 = vadd.f32 %v1868_v34, %v1062_v56 }
 0x301   : > { %v2205_v59 = vpop.f32.mrb[28].mxu1  ;;  %2228 = vmatprep.mubr.msk.f32.mxu0 %vm1100_vm2, %v1063_v57 }
 0x302   : > { %v1072_v60 = vpop.f32.mrb[29].mxu1  ;;  %2229 = vmatmul.mubr.msk.f32.gmra.mrb[26].mxu0 %vm1100_vm2, %v1068_v58  ;;  %v1078_v62 = vadd.f32 %v2205_v59, %v1868_v34 }
 0x303   : > { %v1073_v61 = vadd.f32 %v1868_v34, %v1072_v60 }
 0x305   : > { %v2208_v63 = vpop.f32.mrb[30].mxu1  ;;  %2231 = vmatprep.mubr.msk.f32.mxu1 %vm1100_vm2, %v1073_v61 }
 0x306   : > { %v1082_v0 = vpop.f32.mrb[31].mxu1  ;;  %2232 = vmatmul.mubr.msk.f32.vlgmr.msra.gmra.mrb[32].mxu1 %vm1100_vm2, %v1078_v62  ;;  %v1088_v2 = vadd.f32 %v2208_v63, %v1868_v34 }
 0x307   : > { %v1083_v1 = vadd.f32 %v1868_v34, %v1082_v0  ;;  %2372 = vmatpush3.bf16.msra.mxu1 %v2369_v33  ;;  %v1536_v0 = vld [vmem:[%s3073_s11 + $0x30] sm:$0xff] }
 0x308   : > { %2374 = vmatprep.subr.bf16.mxu1 %v2373_v5 }
 0x309   : > { %2234 = vmatprep.mubr.msk.f32.mxu1 %vm1100_vm2, %v1083_v1  ;;  %v1537_v1 = vld [vmem:[%s3073_s11 + $0x38] sm:$0xff] }
 0x30a   : > { %2235 = vmatmul.mubr.msk.f32.gmra.mrb[34].mxu1 %vm1100_vm2, %v1088_v2  ;;  %v2389_v2 = vpack.c.bf16 %v1537_v1, %v1536_v0 }
 0x30b   : > { %2376 = vmatpush3.bf16.msra.mxu1 %v2373_v5 }
 0x30c   : > { %2390 = vmatprep.subr.bf16.mxu0 %v2389_v2 }
 0x30d   : > { %2392 = vmatpush3.bf16.msra.mxu0 %v2389_v2 }
 0x3c1   : > { %v2215_v16 = vpop.f32.mrb[16].mxu0 }
 0x3c2   : > { %v1221_v17 = vadd.f32 %v2215_v16, %v1885_v15  ;;  %v1215_v18 = vpop.f32.mrb[17].mxu0 }
 0x3c3   : > { %v1216_v19 = vadd.f32 %v1885_v15, %v1215_v18 }
 0x3c4   : > { %v1295_v22 = vmax.f32 %v1221_v17, 0.0 }
 0x3c5   : > { %v1294_v20 = vmax.f32 %v1216_v19, 0.0  ;;  %v2218_v21 = vpop.f32.mrb[18].mxu0 }
 0x3c6   : > { %v1231_v23 = vadd.f32 %v2218_v21, %v1885_v15  ;;  %v1225_v24 = vpop.f32.mrb[19].mxu0 }
 0x3c7   : > { %v1226_v25 = vadd.f32 %v1885_v15, %v1225_v24  ;;  %2245 = vmatprep.mubr.msk.f32.mxu1 %vm897_vm1, %v1294_v20 }
 0x3c8   : > { %2246 = vmatmul.mubr.msk.f32.vlgmr.msra.gmra.mrb[36].mxu1 %vm897_vm1, %v1295_v22  ;;  %v1297_v28 = vmax.f32 %v1231_v23, 0.0 }
 0x3c9   : > { %v1296_v26 = vmax.f32 %v1226_v25, 0.0  ;;  %v2221_v27 = vpop.f32.mrb[20].mxu0 }
 0x3ca   : > { %v1241_v29 = vadd.f32 %v2221_v27, %v1885_v15  ;;  %v1235_v30 = vpop.f32.mrb[21].mxu0 }
 0x3cb   : > { %v1236_v31 = vadd.f32 %v1885_v15, %v1235_v30  ;;  %2248 = vmatprep.mubr.msk.f32.mxu1 %vm897_vm1, %v1296_v26 }
 0x3cc   : > { %2249 = vmatmul.mubr.msk.f32.gmra.mrb[38].mxu1 %vm897_vm1, %v1297_v28  ;;  %v1299_v34 = vmax.f32 %v1241_v29, 0.0 }
 0x3cd   : > { %v1298_v32 = vmax.f32 %v1236_v31, 0.0  ;;  %v2224_v33 = vpop.f32.mrb[22].mxu0 }
 0x3ce   : > { %v1251_v35 = vadd.f32 %v2224_v33, %v1885_v15  ;;  %v1245_v36 = vpop.f32.mrb[23].mxu0 }
 0x3cf   : > { %v1246_v37 = vadd.f32 %v1885_v15, %v1245_v36  ;;  %2251 = vmatprep.mubr.msk.f32.mxu1 %vm897_vm1, %v1298_v32 }
 0x3d0   : > { %2252 = vmatmul.mubr.msk.f32.gmra.mrb[40].mxu1 %vm897_vm1, %v1299_v34  ;;  %v1301_v40 = vmax.f32 %v1251_v35, 0.0 }
 0x3d1   : > { %v1300_v38 = vmax.f32 %v1246_v37, 0.0  ;;  %v2227_v39 = vpop.f32.mrb[24].mxu0 }
 0x3d2   : > { %v1261_v41 = vadd.f32 %v2227_v39, %v1885_v15  ;;  %v1255_v42 = vpop.f32.mrb[25].mxu0 }
 0x3d3   : > { %v1256_v43 = vadd.f32 %v1885_v15, %v1255_v42  ;;  %2254 = vmatprep.mubr.msk.f32.mxu1 %vm897_vm1, %v1300_v38 }
 0x3d4   : > { %2255 = vmatmul.mubr.msk.f32.gmra.mrb[42].mxu1 %vm897_vm1, %v1301_v40  ;;  %v1303_v46 = vmax.f32 %v1261_v41, 0.0 }
 0x3d5   : > { %v1302_v44 = vmax.f32 %v1256_v43, 0.0  ;;  %v2230_v45 = vpop.f32.mrb[26].mxu0 }
 0x3d6   : > { %v1271_v47 = vadd.f32 %v2230_v45, %v1885_v15  ;;  %v1265_v48 = vpop.f32.mrb[27].mxu0 }
 0x3d7   : > { %v1266_v49 = vadd.f32 %v1885_v15, %v1265_v48  ;;  %2257 = vmatprep.mubr.msk.f32.mxu1 %vm897_vm1, %v1302_v44 }
 0x3d8   : > { %2258 = vmatmul.mubr.msk.f32.gmra.mrb[44].mxu1 %vm897_vm1, %v1303_v46  ;;  %v1305_v52 = vmax.f32 %v1271_v47, 0.0 }
 0x3d9   : > { %v1304_v50 = vmax.f32 %v1266_v49, 0.0  ;;  %v2233_v51 = vpop.f32.mrb[32].mxu1 }
 0x3da   : > { %v1281_v53 = vadd.f32 %v2233_v51, %v1885_v15  ;;  %v1275_v54 = vpop.f32.mrb[33].mxu1 }
 0x3db   : > { %v1276_v55 = vadd.f32 %v1885_v15, %v1275_v54  ;;  %2260 = vmatprep.mubr.msk.f32.mxu1 %vm897_vm1, %v1304_v50 }
 0x3dc   : > { %2261 = vmatmul.mubr.msk.f32.gmra.mrb[46].mxu1 %vm897_vm1, %v1305_v52  ;;  %v1307_v58 = vmax.f32 %v1281_v53, 0.0  ;;  %v1919_v52 = vld [vmem:[%s3074_s12] ss:$0 sm:$0xff] }
 0x3dd   : > { %v1306_v56 = vmax.f32 %v1276_v55, 0.0  ;;  %v2236_v57 = vpop.f32.mrb[34].mxu1 }
 0x3de   : > { %v1291_v59 = vadd.f32 %v2236_v57, %v1885_v15  ;;  %v1285_v60 = vpop.f32.mrb[35].mxu1 }
 0x3df   : > { %v1286_v61 = vadd.f32 %v1885_v15, %v1285_v60  ;;  %2263 = vmatprep.mubr.msk.f32.mxu1 %vm897_vm1, %v1306_v56 }
 0x3e0   : > { %2264 = vmatmul.mubr.msk.f32.gmra.mrb[48].mxu1 %vm897_vm1, %v1307_v58  ;;  %v1309_v63 = vmax.f32 %v1291_v59, 0.0 }
 0x3e1   : > { %v1308_v62 = vmax.f32 %v1286_v61, 0.0 }
 0x3e3   : > { %2266 = vmatprep.mubr.msk.f32.mxu1 %vm897_vm1, %v1308_v62 }
 0x3e4   : > { %2267 = vmatmul.mubr.msk.f32.gmra.mrb[50].mxu1 %vm897_vm1, %v1309_v63 }
 0x49b   : > { %v2247_v4 = vpop.f32.mrb[36].mxu1 }
 0x49c   : > { %v1441_v5 = vadd.f32 %v2247_v4, %v1902_v3  ;;  %v1435_v6 = vpop.f32.mrb[37].mxu1 }
 0x49d   : > { %v1436_v7 = vadd.f32 %v1902_v3, %v1435_v6 }
 0x49e   : > { %v1515_v10 = vmax.f32 %v1441_v5, 0.0 }
 0x49f   : > { %v1514_v8 = vmax.f32 %v1436_v7, 0.0  ;;  %v2250_v9 = vpop.f32.mrb[38].mxu1 }
 0x4a0   : > { %v1451_v11 = vadd.f32 %v2250_v9, %v1902_v3  ;;  %v1445_v12 = vpop.f32.mrb[39].mxu1 }
 0x4a1   : > { %v1446_v13 = vadd.f32 %v1902_v3, %v1445_v12  ;;  %2285 = vmatprep.mubr.msk.f32.mxu0 %vm676_vm0, %v1514_v8 }
 0x4a2   : > { %2286 = vmatmul.mubr.msk.f32.vlgmr.msra.gmra.mrb[28].mxu0 %vm676_vm0, %v1515_v10  ;;  %v1517_v16 = vmax.f32 %v1451_v11, 0.0 }
 0x4a3   : > { %v1516_v14 = vmax.f32 %v1446_v13, 0.0  ;;  %v2253_v15 = vpop.f32.mrb[40].mxu1 }
 0x4a4   : > { %v1461_v17 = vadd.f32 %v2253_v15, %v1902_v3  ;;  %v1455_v18 = vpop.f32.mrb[41].mxu1 }
 0x4a5   : > { %v1456_v19 = vadd.f32 %v1902_v3, %v1455_v18  ;;  %2288 = vmatprep.mubr.msk.f32.mxu0 %vm676_vm0, %v1516_v14 }
 0x4a6   : > { %2289 = vmatmul.mubr.msk.f32.gmra.mrb[30].mxu0 %vm676_vm0, %v1517_v16  ;;  %v1519_v22 = vmax.f32 %v1461_v17, 0.0 }
 0x4a7   : > { %v1518_v20 = vmax.f32 %v1456_v19, 0.0  ;;  %v2256_v21 = vpop.f32.mrb[42].mxu1 }
 0x4a8   : > { %v1471_v23 = vadd.f32 %v2256_v21, %v1902_v3  ;;  %v1465_v24 = vpop.f32.mrb[43].mxu1 }
 0x4a9   : > { %v1466_v25 = vadd.f32 %v1902_v3, %v1465_v24  ;;  %2291 = vmatprep.mubr.msk.f32.mxu0 %vm676_vm0, %v1518_v20 }
 0x4aa   : > { %2292 = vmatmul.mubr.msk.f32.gmra.mrb[32].mxu0 %vm676_vm0, %v1519_v22  ;;  %v1521_v28 = vmax.f32 %v1471_v23, 0.0 }
 0x4ab   : > { %v1520_v26 = vmax.f32 %v1466_v25, 0.0  ;;  %v2259_v27 = vpop.f32.mrb[44].mxu1 }
 0x4ac   : > { %v1481_v29 = vadd.f32 %v2259_v27, %v1902_v3  ;;  %v1475_v30 = vpop.f32.mrb[45].mxu1 }
 0x4ad   : > { %v1476_v31 = vadd.f32 %v1902_v3, %v1475_v30  ;;  %2294 = vmatprep.mubr.msk.f32.mxu0 %vm676_vm0, %v1520_v26 }
 0x4ae   : > { %2295 = vmatmul.mubr.msk.f32.gmra.mrb[34].mxu0 %vm676_vm0, %v1521_v28  ;;  %v1523_v34 = vmax.f32 %v1481_v29, 0.0 }
 0x4af   : > { %v1522_v32 = vmax.f32 %v1476_v31, 0.0  ;;  %v2262_v33 = vpop.f32.mrb[46].mxu1 }
 0x4b0   : > { %v1491_v35 = vadd.f32 %v2262_v33, %v1902_v3  ;;  %v1485_v36 = vpop.f32.mrb[47].mxu1 }
 0x4b1   : > { %v1486_v37 = vadd.f32 %v1902_v3, %v1485_v36  ;;  %2297 = vmatprep.mubr.msk.f32.mxu0 %vm676_vm0, %v1522_v32 }
 0x4b2   : > { %2298 = vmatmul.mubr.msk.f32.gmra.mrb[36].mxu0 %vm676_vm0, %v1523_v34  ;;  %v1525_v40 = vmax.f32 %v1491_v35, 0.0 }
 0x4b3   : > { %v1524_v38 = vmax.f32 %v1486_v37, 0.0  ;;  %v2265_v39 = vpop.f32.mrb[48].mxu1 }
 0x4b4   : > { %v1501_v41 = vadd.f32 %v2265_v39, %v1902_v3  ;;  %v1495_v42 = vpop.f32.mrb[49].mxu1 }
 0x4b5   : > { %v1496_v43 = vadd.f32 %v1902_v3, %v1495_v42  ;;  %2300 = vmatprep.mubr.msk.f32.mxu0 %vm676_vm0, %v1524_v38 }
 0x4b6   : > { %2301 = vmatmul.mubr.msk.f32.gmra.mrb[38].mxu0 %vm676_vm0, %v1525_v40  ;;  %v1527_v46 = vmax.f32 %v1501_v41, 0.0 }
 0x4b7   : > { %v1526_v44 = vmax.f32 %v1496_v43, 0.0  ;;  %v2268_v45 = vpop.f32.mrb[50].mxu1 }
 0x4b8   : > { %v1511_v47 = vadd.f32 %v2268_v45, %v1902_v3  ;;  %v1505_v48 = vpop.f32.mrb[51].mxu1 }
 0x4b9   : > { %v1506_v49 = vadd.f32 %v1902_v3, %v1505_v48  ;;  %2303 = vmatprep.mubr.msk.f32.mxu0 %vm676_vm0, %v1526_v44 }
 0x4ba   : > { %2304 = vmatmul.mubr.msk.f32.gmra.mrb[40].mxu0 %vm676_vm0, %v1527_v46  ;;  %v1529_v51 = vmax.f32 %v1511_v47, 0.0 }
 0x4bb   : > { %v1528_v50 = vmax.f32 %v1506_v49, 0.0 }
 0x4bd   : > { %2306 = vmatprep.mubr.msk.f32.mxu0 %vm676_vm0, %v1528_v50 }
 0x4be   : > { %2307 = vmatmul.mubr.msk.f32.gmra.mrb[42].mxu0 %vm676_vm0, %v1529_v51 }
 0x575   : > { %v2287_v53 = vpop.f32.mrb[28].mxu0 }
 0x576   : > { %v1665_v54 = vadd.f32 %v2287_v53, %v1919_v52  ;;  %v1659_v55 = vpop.f32.mrb[29].mxu0 }
 0x577   : > { %v1660_v56 = vadd.f32 %v1919_v52, %v1659_v55 }
 0x578   : > { %1739 = vst [vmem:[%s2994_s27 + $0x8] sm:$0xff] %v1665_v54 }
 0x579   : > { %1738 = vst [vmem:[%s2994_s27] sm:$0xff] %v1660_v56  ;;  %v2290_v57 = vpop.f32.mrb[30].mxu0 }
 0x57a   : > { %v1675_v58 = vadd.f32 %v2290_v57, %v1919_v52  ;;  %v1669_v59 = vpop.f32.mrb[31].mxu0 }
 0x57b   : > { %v1670_v60 = vadd.f32 %v1919_v52, %v1669_v59 }
 0x57c   : > { %1741 = vst [vmem:[%s2994_s27 + $0x18] sm:$0xff] %v1675_v58 }
 0x57d   : > { %1740 = vst [vmem:[%s2994_s27 + $0x10] sm:$0xff] %v1670_v60  ;;  %v2293_v61 = vpop.f32.mrb[32].mxu0 }
 0x57e   : > { %v1685_v62 = vadd.f32 %v2293_v61, %v1919_v52  ;;  %v1679_v63 = vpop.f32.mrb[33].mxu0 }
 0x57f   : > { %v1680_v0 = vadd.f32 %v1919_v52, %v1679_v63 }
 0x580   : > { %1743 = vst [vmem:[%s2994_s27 + $0x28] sm:$0xff] %v1685_v62 }
 0x581   : > { %1742 = vst [vmem:[%s2994_s27 + $0x20] sm:$0xff] %v1680_v0  ;;  %v2296_v1 = vpop.f32.mrb[34].mxu0 }
 0x582   : > { %v1695_v2 = vadd.f32 %v2296_v1, %v1919_v52  ;;  %v1689_v3 = vpop.f32.mrb[35].mxu0 }
 0x583   : > { %v1690_v4 = vadd.f32 %v1919_v52, %v1689_v3 }
 0x584   : > { %1745 = vst [vmem:[%s2994_s27 + $0x38] sm:$0xff] %v1695_v2 }
 0x585   : > { %1744 = vst [vmem:[%s2994_s27 + $0x30] sm:$0xff] %v1690_v4  ;;  %v2299_v5 = vpop.f32.mrb[36].mxu0 }
 0x586   : > { %v1705_v6 = vadd.f32 %v2299_v5, %v1919_v52  ;;  %v1699_v7 = vpop.f32.mrb[37].mxu0 }
 0x587   : > { %v1700_v8 = vadd.f32 %v1919_v52, %v1699_v7 }
 0x588   : > { %1747 = vst [vmem:[%s2994_s27 + $0x48] sm:$0xff] %v1705_v6 }
 0x589   : > { %1746 = vst [vmem:[%s2994_s27 + $0x40] sm:$0xff] %v1700_v8  ;;  %v2302_v9 = vpop.f32.mrb[38].mxu0 }
 0x58a   : > { %v1715_v10 = vadd.f32 %v2302_v9, %v1919_v52  ;;  %v1709_v11 = vpop.f32.mrb[39].mxu0 }
 0x58b   : > { %v1710_v12 = vadd.f32 %v1919_v52, %v1709_v11 }
 0x58c   : > { %1749 = vst [vmem:[%s2994_s27 + $0x58] sm:$0xff] %v1715_v10 }
 0x58d   : > { %1748 = vst [vmem:[%s2994_s27 + $0x50] sm:$0xff] %v1710_v12  ;;  %v2305_v13 = vpop.f32.mrb[40].mxu0 }
 0x58e   : > { %v1725_v14 = vadd.f32 %v2305_v13, %v1919_v52  ;;  %v1719_v15 = vpop.f32.mrb[41].mxu0 }
 0x58f   : > { %v1720_v16 = vadd.f32 %v1919_v52, %v1719_v15 }
 0x590   : > { %1751 = vst [vmem:[%s2994_s27 + $0x68] sm:$0xff] %v1725_v14 }
 0x591   : > { %1750 = vst [vmem:[%s2994_s27 + $0x60] sm:$0xff] %v1720_v16  ;;  %v2308_v17 = vpop.f32.mrb[42].mxu0 }
 0x592   : > { %v1735_v18 = vadd.f32 %v2308_v17, %v1919_v52  ;;  %v1729_v19 = vpop.f32.mrb[43].mxu0 }
 0x593   : > { %v1730_v20 = vadd.f32 %v1919_v52, %v1729_v19 }
 0x594   : > { %1753 = vst [vmem:[%s2994_s27 + $0x78] sm:$0xff] %v1735_v18 }
 0x595   : > { %1752 = vst [vmem:[%s2994_s27 + $0x70] sm:$0xff] %v1730_v20 }
 0x596   : > { %2488 = shalt.err (!%p2485_p1)
}
 0x597   : > { %s2489_s19 = scalar_lea.hbm %s3015_s22, 2048  ;;  %s2493_s27 = scalar_lea.hbm %s3075_s13, 8192 }
 0x598   : > { %p2490_p3 = scmp.ne.s32.totalorder %s3015_s22, %s2489_s19  ;;  %p2494_p0 = scmp.lt.u32.totalorder %s3015_s22, %s3075_s13 }
 0x599   : > { %p2495_p2 = scmp.lt.u32.totalorder %s2493_s27, %s2489_s19  ;;  %p2497_p6 = scmp.lt.u32.totalorder %s2489_s19, %s3015_s22 }
 0x59a   : > { %p2491_p4 = pnand %p2490_p3, %p3096_p10 }
 0x59b   : > { %p2496_p7 = por %p2495_p2, %p2494_p0 }
 0x59c   : > { %p2492_p5 = pneg %p2491_p4 }
 0x59d   : > { %p2498_p11 = por %p2497_p6, %p2496_p7 }
 0x59f   : > { %p2499_p12 = pnand %p2498_p11, %p2492_p5 }
 0x5a1   : > { %2502 = shalt.err (!%p2499_p12)
}
 0x5a2   : > { %s2547_s17 = smov 128   ;;  %s2548_s16 = smov 8  }
 0x5a3   : > { %2397 = dma.vmem_to_hbm [thread:$0]  (%p3096_p10), %s3017_s0, 2048, %s3015_s22, %s1755_s29, %s2547_s17, %s2547_s17, %s2548_s16  }
 0x5a4 PF: > { %s3097_s18 = sld [smem:[#allocation8_spill]]  ;;  %p2408_p8 = scmp.ge.s32.totalorder %s2541_s28, 2 }
 0x5a5   : > { %p3098_p9 = scmp.ne.s32.totalorder %s3092_s21, 0 }
 0x5a7   : > { %p2404_p13 = pnand %p2408_p8, %p3098_p9 }
 0x5aa   : > { %s1783_s15 = sand.u32 1, %s3097_s18  }
 0x5ab   : > { %s1784_s24 = scalar_lea.sflag [#allocation4], %s1783_s15 }
 0x5ac   : > { %2524 = dma.done.wait (!%p2404_p13), %s1784_s24, 2048  }
 0x5ad   : > { %2526 = vsyncadd (!%p2404_p13), %s1784_s24, 4294965248  ;;  %s3099_s28 = sld [smem:[#allocation11_spill]]  ;;  %s3100_s25 = sld [smem:[#allocation9_spill]] }
 0x5ae   : > { %s3101_s26 = sld [smem:[#allocation10_spill]]  ;;  %s3102_s27 = sld [smem:[#allocation12_spill]] }
 0x5b3   : > { %p26_p1 = scmp.ge.s32.totalorder %s3099_s28, 6  }
 0x5b5   :  { %28 = sbr.rel (!%p26_p1) target bundleno = 7 (0x7), region = 117 }
 0x5bc   :  { %1789 = vsyncpa [#allocation3], 1 }
 0x5bd   :  { %1791 = vsyncpa [#allocation3 + $0x1], 1 }
 0x5be   :  { %1792 = vsyncpa [#allocation4], 1 }
 0x5bf   :  { %1794 = vsyncpa [#allocation4 + $0x1], 1 }

</bundles_post_ra>
